<compile_context>
chip_gen: v5e
topology: v5e:2x2
jax: 0.10.0
libtpu: 0.0.40
codegen_flags: <defaults>
</compile_context>

<pallas_src>
import functools
import numpy as np
import jax
import jax.numpy as jnp
from jax import lax
from jax.experimental import pallas as pl
from jax.experimental.pallas import tpu as pltpu


# ---------------------------------------------------------------------------
# Kernels
# ---------------------------------------------------------------------------
def _mapping_kernel_resident(x_ref, w_ref, b_ref, o_ref, *, n_mlp, matmul_dtype):
    # x_ref: (TB, D)   w_ref: (n_mlp, D, D) gain-folded   b_ref: (n_mlp, 1, D) gain-folded
    x = x_ref[...].astype(jnp.float32)

    # --- PixelNorm: x / sqrt(mean(x^2, dim=1) + 1e-6) ---
    denom = jnp.mean(x * x, axis=1, keepdims=True) + 1e-6
    x = x * lax.rsqrt(denom)

    # --- n_mlp x (FC + LeakyReLU(0.2)), gains already folded into w/b ---
    def body(i, xi):
        w = w_ref[i]                                   # (D, D), matmul_dtype
        b = b_ref[i]                                   # (1, D), f32
        y = jnp.dot(xi.astype(matmul_dtype), w,
                    preferred_element_type=jnp.float32) + b
        return jnp.maximum(y, 0.2 * y)                 # LeakyReLU(0.2)

    x = lax.fori_loop(0, n_mlp, body, x, unroll=True)
    o_ref[...] = x.astype(o_ref.dtype)


def _mapping_kernel_streamed(x_ref, w_ref, b_ref, o_ref, act_ref, *, n_mlp, matmul_dtype):
    # Layer-streaming variant: grid axis 1 walks layers, one (D, D) weight block
    # in flight at a time, activation carried across layers in VMEM scratch.
    k = pl.program_id(1)

    @pl.when(k == 0)
    def _():
        x = x_ref[...].astype(jnp.float32)
        denom = jnp.mean(x * x, axis=1, keepdims=True) + 1e-6
        act_ref[...] = x * lax.rsqrt(denom)

    y = jnp.dot(act_ref[...].astype(matmul_dtype), w_ref[0],
                preferred_element_type=jnp.float32) + b_ref[0]
    act_ref[...] = jnp.maximum(y, 0.2 * y)             # LeakyReLU(0.2)

    @pl.when(k == n_mlp - 1)
    def _():
        o_ref[...] = act_ref[...].astype(o_ref.dtype)


# ---------------------------------------------------------------------------
# Wrapper
# ---------------------------------------------------------------------------
def _choose_tiling(B, tile_cap):
    """Return (padded_B, tile_b): tile_b is a multiple of 8 dividing padded_B
    (or tile_b == B when B < 8, which is a full-extent block)."""
    if B < 8:
        return B, B
    padded = ((B + 7) // 8) * 8
    tile = max(8, (min(tile_cap, padded) // 8) * 8)
    while padded % tile != 0:
        tile -= 8
    return padded, tile


def mapping_network(x, weights, biases, *, lr_multiplier=0.01, tile_b=None,
                    tile_cap=256, matmul_dtype=jnp.bfloat16, stream_layers=None):
    """x: (B, D). weights: (n_mlp, D, D) already transposed to (D_in, D_out).
    biases: (n_mlp, D).

    matmul_dtype=bf16 (default) runs MXU-friendly bf16 matmuls with f32
    accumulation; rounding compounds over n_mlp layers (~1e-2 rel error).
    Pass matmul_dtype=jnp.float32 for PyTorch-exact numerics.
    tile_cap: use 128 on v5e (128x128 MXU), 256 on v6e/v7x."""
    B, D = x.shape
    n_mlp = weights.shape[0]

    # --- batch tiling / padding (never a sub-8 non-full block) ---
    if tile_b is None:
        padded_B, tile_b = _choose_tiling(B, tile_cap)
    else:
        padded_B = ((B + tile_b - 1) // tile_b) * tile_b
    num_tiles = padded_B // tile_b

    x_in = x if padded_B == B else jnp.pad(x, ((0, padded_B - B), (0, 0)))

    # --- fold the gains into the parameters once (off the serial critical path) ---
    weight_gain = lr_multiplier / np.sqrt(D)
    bias_gain = lr_multiplier
    w_scaled = (weights.astype(jnp.float32) * jnp.float32(weight_gain)).astype(matmul_dtype)
    b_scaled = (biases.astype(jnp.float32) * jnp.float32(bias_gain)).reshape(n_mlp, 1, D)

    itemsize_w = jnp.dtype(matmul_dtype).itemsize
    itemsize_x = x.dtype.itemsize
    weight_bytes = n_mlp * D * D * itemsize_w
    bias_bytes = n_mlp * D * 4
    io_bytes = 2 * tile_b * D * itemsize_x * 2          # x tile + out tile, double-buffered

    # Auto-select streaming when the resident weight stack would strain VMEM
    # (e.g. D>=1024 f32; v7x has only 64 MiB physical / 32 MiB default scoped).
    if stream_layers is None:
        stream_layers = weight_bytes > (24 << 20)

    if stream_layers:
        # 2 in-flight (D, D) weight blocks + activation scratch + I/O tiles.
        needed = 2 * D * D * itemsize_w + 2 * D * 4 + tile_b * D * 4 + io_bytes
        weight_fetches = num_tiles                       # weights re-fetched per B tile
    else:
        # Buffered(1): single resident copy of the full weight/bias stack.
        needed = weight_bytes + bias_bytes + io_bytes
        weight_fetches = 1
    vmem_limit = int(min(max(32 << 20, int(needed * 1.5) + (4 << 20)), 128 << 20))

    cost = pl.CostEstimate(
        flops=2 * padded_B * D * D * n_mlp,
        transcendentals=padded_B,                        # one rsqrt per row (PixelNorm)
        bytes_accessed=(padded_B * D * itemsize_x        # x in
                        + padded_B * D * itemsize_x      # out
                        + weight_fetches * weight_bytes
                        + weight_fetches * bias_bytes),
    )

    if stream_layers:
        kernel = functools.partial(_mapping_kernel_streamed, n_mlp=n_mlp,
                                   matmul_dtype=matmul_dtype)
        grid = (num_tiles, n_mlp)
        in_specs = [
            pl.BlockSpec((tile_b, D), lambda i, k: (i, 0)),
            pl.BlockSpec((1, D, D), lambda i, k: (k, 0, 0)),
            pl.BlockSpec((1, 1, D), lambda i, k: (k, 0, 0)),
        ]
        out_specs = pl.BlockSpec((tile_b, D), lambda i, k: (i, 0))
        scratch_shapes = [pltpu.VMEM((tile_b, D), jnp.float32)]
        dims = (("parallel" if num_tiles > 2 else "arbitrary"), "arbitrary")
    else:
        kernel = functools.partial(_mapping_kernel_resident, n_mlp=n_mlp,
                                   matmul_dtype=matmul_dtype)
        grid = (num_tiles,)
        in_specs = [
            pl.BlockSpec((tile_b, D), lambda i: (i, 0)),
            # Constant index_map -> fetched once; single buffer is enough.
            pl.BlockSpec((n_mlp, D, D), lambda i: (0, 0, 0),
                         pipeline_mode=pl.Buffered(1)),
            pl.BlockSpec((n_mlp, 1, D), lambda i: (0, 0, 0),
                         pipeline_mode=pl.Buffered(1)),
        ]
        out_specs = pl.BlockSpec((tile_b, D), lambda i: (i, 0))
        scratch_shapes = []
        # Only ask for megacore sharding when there is enough work per core to
        # amortize the duplicated weight DMA.
        dims = ("parallel",) if num_tiles > 2 else ("arbitrary",)

    out = pl.pallas_call(
        kernel,
        out_shape=jax.ShapeDtypeStruct((padded_B, D), x.dtype),
        grid_spec=pltpu.PrefetchScalarGridSpec(
            num_scalar_prefetch=0,
            grid=grid,
            in_specs=in_specs,
            out_specs=out_specs,
            scratch_shapes=scratch_shapes,
        ),
        compiler_params=pltpu.CompilerParams(
            dimension_semantics=dims,
            vmem_limit_bytes=vmem_limit,
        ),
        cost_estimate=cost,
    )(x_in, w_scaled, b_scaled)

    return out if padded_B == B else out[:B]


# ---------------------------------------------------------------------------
# Pure-JAX reference
# ---------------------------------------------------------------------------
def mapping_network_ref(x, weights, biases, *, lr_multiplier=0.01):
    D = x.shape[1]
    weight_gain = lr_multiplier / np.sqrt(D)
    bias_gain = lr_multiplier
    x = x / jnp.sqrt(jnp.mean(x**2, axis=1, keepdims=True) + 1e-6)
    for i in range(weights.shape[0]):
        y = x @ (weights[i] * weight_gain) + biases[i] * bias_gain
        x = jnp.where(y >= 0, y, 0.2 * y)
    return x


if __name__ == "__main__":
    # Small shapes consistent with the module: batch=16, code_dim=128, n_mlp=8.
    B, D, N_MLP = 16, 128, 8
    LR_MULT = 0.01

    key = jax.random.PRNGKey(0)
    kx, kw, kx2 = jax.random.split(key, 3)
    x = jax.random.normal(kx, (B, D), dtype=jnp.float32)

    # PyTorch init: weight = randn([out, in]) / lr_multiplier; bias = 0.
    # Store transposed: (n_mlp, D_in, D_out) so the kernel computes x @ W.
    w_torch_layout = jax.random.normal(kw, (N_MLP, D, D), dtype=jnp.float32) / LR_MULT
    weights = jnp.transpose(w_torch_layout, (0, 2, 1))
    biases = jnp.zeros((N_MLP, D), dtype=jnp.float32)

    ref = mapping_network_ref(x, weights, biases, lr_multiplier=LR_MULT)

    # 1) f32 resident path (exact): tile_b=8 -> 2 grid steps.
    out_f32 = mapping_network(x, weights, biases, lr_multiplier=LR_MULT, tile_b=8,
                              matmul_dtype=jnp.float32, stream_layers=False)
    out_f32 = jax.block_until_ready(out_f32)
    np.testing.assert_allclose(np.asarray(out_f32), np.asarray(ref), rtol=1e-4, atol=1e-4)

    # 2) Default path (bf16 matmul inputs, f32 accumulation); looser tolerance.
    out_bf16 = mapping_network(x, weights, biases, lr_multiplier=LR_MULT)
    out_bf16 = jax.block_until_ready(out_bf16)
    np.testing.assert_allclose(np.asarray(out_bf16), np.asarray(ref), rtol=2e-2, atol=2e-2)

    # 3) Layer-streaming path (forced), f32, exact.
    out_str = mapping_network(x, weights, biases, lr_multiplier=LR_MULT, tile_b=8,
                              matmul_dtype=jnp.float32, stream_layers=True)
    out_str = jax.block_until_ready(out_str)
    np.testing.assert_allclose(np.asarray(out_str), np.asarray(ref), rtol=1e-4, atol=1e-4)

    # 4) Non-multiple-of-8 batch exercises the padding path (B=20 -> padded 24).
    B2 = 20
    x2 = jax.random.normal(kx2, (B2, D), dtype=jnp.float32)
    ref2 = mapping_network_ref(x2, weights, biases, lr_multiplier=LR_MULT)
    out2 = mapping_network(x2, weights, biases, lr_multiplier=LR_MULT,
                           matmul_dtype=jnp.float32, stream_layers=False)
    out2 = jax.block_until_ready(out2)
    np.testing.assert_allclose(np.asarray(out2), np.asarray(ref2), rtol=1e-4, atol=1e-4)

    print("KERNEL_OK")
</pallas_src>

<mosaic_0001>
module attributes {stable_mosaic.version = 11 : i64} {
  func.func @_mapping_kernel_resident(%arg0: i32, %arg1: memref<8x128xf32, #tpu.memory_space<vmem>>, %arg2: memref<8x128x128xf32, #tpu.memory_space<vmem>>, %arg3: memref<8x1x128xf32, #tpu.memory_space<vmem>>, %arg4: memref<8x128xf32, #tpu.memory_space<vmem>>) attributes {dimension_semantics = [#tpu.dimension_semantics<arbitrary>], iteration_bounds = array<i64: 2>, scalar_prefetch = 0 : i64, scratch_operands = 0 : i64, tpu.core_type = #tpu.core_type<tc>, window_params = [{transform_indices = @transform_0, window_bounds = array<i64: 8, 128>}, {pipeline_mode = #tpu.pipeline_mode<synchronous>, transform_indices = @transform_1, window_bounds = array<i64: 8, 128, 128>}, {pipeline_mode = #tpu.pipeline_mode<synchronous>, transform_indices = @transform_2, window_bounds = array<i64: 8, 1, 128>}, {transform_indices = @transform_3, window_bounds = array<i64: 8, 128>}]} {
    %c0 = arith.constant 0 : index
    %c0_0 = arith.constant 0 : index
    %0 = vector.load %arg1[%c0, %c0_0] : memref<8x128xf32, #tpu.memory_space<vmem>>, vector<8x128xf32>
    %1 = arith.mulf %0, %0 : vector<8x128xf32>
    %cst = arith.constant dense<0.000000e+00> : vector<8xf32>
    %2 = vector.multi_reduction <add>, %1, %cst [1] : vector<8x128xf32> to vector<8xf32>
    %3 = vector.shape_cast %2 : vector<8xf32> to vector<8x1xf32>
    %cst_1 = arith.constant 1.280000e+02 : f32
    %4 = vector.broadcast %cst_1 : f32 to vector<8x1xf32>
    %5 = arith.divf %3, %4 : vector<8x1xf32>
    %cst_2 = arith.constant 9.99999997E-7 : f32
    %6 = vector.broadcast %cst_2 : f32 to vector<8x1xf32>
    %7 = arith.addf %5, %6 : vector<8x1xf32>
    %8 = math.rsqrt %7 : vector<8x1xf32>
    %9 = vector.broadcast %8 : vector<8x1xf32> to vector<8x128xf32>
    %10 = arith.mulf %0, %9 : vector<8x128xf32>
    %c0_i32 = arith.constant 0 : i32
    %11 = arith.index_cast %c0_i32 : i32 to index
    %c0_3 = arith.constant 0 : index
    %c0_4 = arith.constant 0 : index
    %12 = vector.load %arg2[%11, %c0_3, %c0_4] : memref<8x128x128xf32, #tpu.memory_space<vmem>>, vector<1x128x128xf32>
    %13 = vector.shape_cast %12 : vector<1x128x128xf32> to vector<128x128xf32>
    %14 = arith.index_cast %c0_i32 : i32 to index
    %c0_5 = arith.constant 0 : index
    %c0_6 = arith.constant 0 : index
    %15 = vector.load %arg3[%14, %c0_5, %c0_6] : memref<8x1x128xf32, #tpu.memory_space<vmem>>, vector<1x1x128xf32>
    %16 = vector.shape_cast %15 : vector<1x1x128xf32> to vector<1x128xf32>
    %cst_7 = arith.constant dense<0.000000e+00> : vector<8x128xf32>
    %17 = tpu.matmul %10, %13, %cst_7 {dimension_numbers = #tpu.dot_dimension_numbers<[1], [0], [0], [1], [0, 0, 1, 1], [], []>} : vector<8x128xf32>, vector<128x128xf32>, vector<8x128xf32> -> vector<8x128xf32>
    %18 = vector.broadcast %16 : vector<1x128xf32> to vector<8x128xf32>
    %19 = arith.addf %17, %18 : vector<8x128xf32>
    %cst_8 = arith.constant 2.000000e-01 : f32
    %20 = vector.broadcast %cst_8 : f32 to vector<8x128xf32>
    %21 = arith.mulf %20, %19 : vector<8x128xf32>
    %22 = arith.maximumf %19, %21 : vector<8x128xf32>
    %c1_i32 = arith.constant 1 : i32
    %23 = arith.index_cast %c1_i32 : i32 to index
    %c0_9 = arith.constant 0 : index
    %c0_10 = arith.constant 0 : index
    %24 = vector.load %arg2[%23, %c0_9, %c0_10] : memref<8x128x128xf32, #tpu.memory_space<vmem>>, vector<1x128x128xf32>
    %25 = vector.shape_cast %24 : vector<1x128x128xf32> to vector<128x128xf32>
    %26 = arith.index_cast %c1_i32 : i32 to index
    %c0_11 = arith.constant 0 : index
    %c0_12 = arith.constant 0 : index
    %27 = vector.load %arg3[%26, %c0_11, %c0_12] : memref<8x1x128xf32, #tpu.memory_space<vmem>>, vector<1x1x128xf32>
    %28 = vector.shape_cast %27 : vector<1x1x128xf32> to vector<1x128xf32>
    %cst_13 = arith.constant dense<0.000000e+00> : vector<8x128xf32>
    %29 = tpu.matmul %22, %25, %cst_13 {dimension_numbers = #tpu.dot_dimension_numbers<[1], [0], [0], [1], [0, 0, 1, 1], [], []>} : vector<8x128xf32>, vector<128x128xf32>, vector<8x128xf32> -> vector<8x128xf32>
    %30 = vector.broadcast %28 : vector<1x128xf32> to vector<8x128xf32>
    %31 = arith.addf %29, %30 : vector<8x128xf32>
    %cst_14 = arith.constant 2.000000e-01 : f32
    %32 = vector.broadcast %cst_14 : f32 to vector<8x128xf32>
    %33 = arith.mulf %32, %31 : vector<8x128xf32>
    %34 = arith.maximumf %31, %33 : vector<8x128xf32>
    %c2_i32 = arith.constant 2 : i32
    %35 = arith.index_cast %c2_i32 : i32 to index
    %c0_15 = arith.constant 0 : index
    %c0_16 = arith.constant 0 : index
    %36 = vector.load %arg2[%35, %c0_15, %c0_16] : memref<8x128x128xf32, #tpu.memory_space<vmem>>, vector<1x128x128xf32>
    %37 = vector.shape_cast %36 : vector<1x128x128xf32> to vector<128x128xf32>
    %38 = arith.index_cast %c2_i32 : i32 to index
    %c0_17 = arith.constant 0 : index
    %c0_18 = arith.constant 0 : index
    %39 = vector.load %arg3[%38, %c0_17, %c0_18] : memref<8x1x128xf32, #tpu.memory_space<vmem>>, vector<1x1x128xf32>
    %40 = vector.shape_cast %39 : vector<1x1x128xf32> to vector<1x128xf32>
    %cst_19 = arith.constant dense<0.000000e+00> : vector<8x128xf32>
    %41 = tpu.matmul %34, %37, %cst_19 {dimension_numbers = #tpu.dot_dimension_numbers<[1], [0], [0], [1], [0, 0, 1, 1], [], []>} : vector<8x128xf32>, vector<128x128xf32>, vector<8x128xf32> -> vector<8x128xf32>
    %42 = vector.broadcast %40 : vector<1x128xf32> to vector<8x128xf32>
    %43 = arith.addf %41, %42 : vector<8x128xf32>
    %cst_20 = arith.constant 2.000000e-01 : f32
    %44 = vector.broadcast %cst_20 : f32 to vector<8x128xf32>
    %45 = arith.mulf %44, %43 : vector<8x128xf32>
    %46 = arith.maximumf %43, %45 : vector<8x128xf32>
    %c3_i32 = arith.constant 3 : i32
    %47 = arith.index_cast %c3_i32 : i32 to index
    %c0_21 = arith.constant 0 : index
    %c0_22 = arith.constant 0 : index
    %48 = vector.load %arg2[%47, %c0_21, %c0_22] : memref<8x128x128xf32, #tpu.memory_space<vmem>>, vector<1x128x128xf32>
    %49 = vector.shape_cast %48 : vector<1x128x128xf32> to vector<128x128xf32>
    %50 = arith.index_cast %c3_i32 : i32 to index
    %c0_23 = arith.constant 0 : index
    %c0_24 = arith.constant 0 : index
    %51 = vector.load %arg3[%50, %c0_23, %c0_24] : memref<8x1x128xf32, #tpu.memory_space<vmem>>, vector<1x1x128xf32>
    %52 = vector.shape_cast %51 : vector<1x1x128xf32> to vector<1x128xf32>
    %cst_25 = arith.constant dense<0.000000e+00> : vector<8x128xf32>
    %53 = tpu.matmul %46, %49, %cst_25 {dimension_numbers = #tpu.dot_dimension_numbers<[1], [0], [0], [1], [0, 0, 1, 1], [], []>} : vector<8x128xf32>, vector<128x128xf32>, vector<8x128xf32> -> vector<8x128xf32>
    %54 = vector.broadcast %52 : vector<1x128xf32> to vector<8x128xf32>
    %55 = arith.addf %53, %54 : vector<8x128xf32>
    %cst_26 = arith.constant 2.000000e-01 : f32
    %56 = vector.broadcast %cst_26 : f32 to vector<8x128xf32>
    %57 = arith.mulf %56, %55 : vector<8x128xf32>
    %58 = arith.maximumf %55, %57 : vector<8x128xf32>
    %c4_i32 = arith.constant 4 : i32
    %59 = arith.index_cast %c4_i32 : i32 to index
    %c0_27 = arith.constant 0 : index
    %c0_28 = arith.constant 0 : index
    %60 = vector.load %arg2[%59, %c0_27, %c0_28] : memref<8x128x128xf32, #tpu.memory_space<vmem>>, vector<1x128x128xf32>
    %61 = vector.shape_cast %60 : vector<1x128x128xf32> to vector<128x128xf32>
    %62 = arith.index_cast %c4_i32 : i32 to index
    %c0_29 = arith.constant 0 : index
    %c0_30 = arith.constant 0 : index
    %63 = vector.load %arg3[%62, %c0_29, %c0_30] : memref<8x1x128xf32, #tpu.memory_space<vmem>>, vector<1x1x128xf32>
    %64 = vector.shape_cast %63 : vector<1x1x128xf32> to vector<1x128xf32>
    %cst_31 = arith.constant dense<0.000000e+00> : vector<8x128xf32>
    %65 = tpu.matmul %58, %61, %cst_31 {dimension_numbers = #tpu.dot_dimension_numbers<[1], [0], [0], [1], [0, 0, 1, 1], [], []>} : vector<8x128xf32>, vector<128x128xf32>, vector<8x128xf32> -> vector<8x128xf32>
    %66 = vector.broadcast %64 : vector<1x128xf32> to vector<8x128xf32>
    %67 = arith.addf %65, %66 : vector<8x128xf32>
    %cst_32 = arith.constant 2.000000e-01 : f32
    %68 = vector.broadcast %cst_32 : f32 to vector<8x128xf32>
    %69 = arith.mulf %68, %67 : vector<8x128xf32>
    %70 = arith.maximumf %67, %69 : vector<8x128xf32>
    %c5_i32 = arith.constant 5 : i32
    %71 = arith.index_cast %c5_i32 : i32 to index
    %c0_33 = arith.constant 0 : index
    %c0_34 = arith.constant 0 : index
    %72 = vector.load %arg2[%71, %c0_33, %c0_34] : memref<8x128x128xf32, #tpu.memory_space<vmem>>, vector<1x128x128xf32>
    %73 = vector.shape_cast %72 : vector<1x128x128xf32> to vector<128x128xf32>
    %74 = arith.index_cast %c5_i32 : i32 to index
    %c0_35 = arith.constant 0 : index
    %c0_36 = arith.constant 0 : index
    %75 = vector.load %arg3[%74, %c0_35, %c0_36] : memref<8x1x128xf32, #tpu.memory_space<vmem>>, vector<1x1x128xf32>
    %76 = vector.shape_cast %75 : vector<1x1x128xf32> to vector<1x128xf32>
    %cst_37 = arith.constant dense<0.000000e+00> : vector<8x128xf32>
    %77 = tpu.matmul %70, %73, %cst_37 {dimension_numbers = #tpu.dot_dimension_numbers<[1], [0], [0], [1], [0, 0, 1, 1], [], []>} : vector<8x128xf32>, vector<128x128xf32>, vector<8x128xf32> -> vector<8x128xf32>
    %78 = vector.broadcast %76 : vector<1x128xf32> to vector<8x128xf32>
    %79 = arith.addf %77, %78 : vector<8x128xf32>
    %cst_38 = arith.constant 2.000000e-01 : f32
    %80 = vector.broadcast %cst_38 : f32 to vector<8x128xf32>
    %81 = arith.mulf %80, %79 : vector<8x128xf32>
    %82 = arith.maximumf %79, %81 : vector<8x128xf32>
    %c6_i32 = arith.constant 6 : i32
    %83 = arith.index_cast %c6_i32 : i32 to index
    %c0_39 = arith.constant 0 : index
    %c0_40 = arith.constant 0 : index
    %84 = vector.load %arg2[%83, %c0_39, %c0_40] : memref<8x128x128xf32, #tpu.memory_space<vmem>>, vector<1x128x128xf32>
    %85 = vector.shape_cast %84 : vector<1x128x128xf32> to vector<128x128xf32>
    %86 = arith.index_cast %c6_i32 : i32 to index
    %c0_41 = arith.constant 0 : index
    %c0_42 = arith.constant 0 : index
    %87 = vector.load %arg3[%86, %c0_41, %c0_42] : memref<8x1x128xf32, #tpu.memory_space<vmem>>, vector<1x1x128xf32>
    %88 = vector.shape_cast %87 : vector<1x1x128xf32> to vector<1x128xf32>
    %cst_43 = arith.constant dense<0.000000e+00> : vector<8x128xf32>
    %89 = tpu.matmul %82, %85, %cst_43 {dimension_numbers = #tpu.dot_dimension_numbers<[1], [0], [0], [1], [0, 0, 1, 1], [], []>} : vector<8x128xf32>, vector<128x128xf32>, vector<8x128xf32> -> vector<8x128xf32>
    %90 = vector.broadcast %88 : vector<1x128xf32> to vector<8x128xf32>
    %91 = arith.addf %89, %90 : vector<8x128xf32>
    %cst_44 = arith.constant 2.000000e-01 : f32
    %92 = vector.broadcast %cst_44 : f32 to vector<8x128xf32>
    %93 = arith.mulf %92, %91 : vector<8x128xf32>
    %94 = arith.maximumf %91, %93 : vector<8x128xf32>
    %c7_i32 = arith.constant 7 : i32
    %95 = arith.index_cast %c7_i32 : i32 to index
    %c0_45 = arith.constant 0 : index
    %c0_46 = arith.constant 0 : index
    %96 = vector.load %arg2[%95, %c0_45, %c0_46] : memref<8x128x128xf32, #tpu.memory_space<vmem>>, vector<1x128x128xf32>
    %97 = vector.shape_cast %96 : vector<1x128x128xf32> to vector<128x128xf32>
    %98 = arith.index_cast %c7_i32 : i32 to index
    %c0_47 = arith.constant 0 : index
    %c0_48 = arith.constant 0 : index
    %99 = vector.load %arg3[%98, %c0_47, %c0_48] : memref<8x1x128xf32, #tpu.memory_space<vmem>>, vector<1x1x128xf32>
    %100 = vector.shape_cast %99 : vector<1x1x128xf32> to vector<1x128xf32>
    %cst_49 = arith.constant dense<0.000000e+00> : vector<8x128xf32>
    %101 = tpu.matmul %94, %97, %cst_49 {dimension_numbers = #tpu.dot_dimension_numbers<[1], [0], [0], [1], [0, 0, 1, 1], [], []>} : vector<8x128xf32>, vector<128x128xf32>, vector<8x128xf32> -> vector<8x128xf32>
    %102 = vector.broadcast %100 : vector<1x128xf32> to vector<8x128xf32>
    %103 = arith.addf %101, %102 : vector<8x128xf32>
    %cst_50 = arith.constant 2.000000e-01 : f32
    %104 = vector.broadcast %cst_50 : f32 to vector<8x128xf32>
    %105 = arith.mulf %104, %103 : vector<8x128xf32>
    %106 = arith.maximumf %103, %105 : vector<8x128xf32>
    %c8_i32 = arith.constant 8 : i32
    %c0_51 = arith.constant 0 : index
    %c0_52 = arith.constant 0 : index
    %107 = vector.load %arg4[%c0_51, %c0_52] : memref<8x128xf32, #tpu.memory_space<vmem>>, vector<8x128xf32>
    tpu.vector_store %arg4[%c0_51, %c0_52], %106 {strides = array<i32>} : memref<8x128xf32, #tpu.memory_space<vmem>>, vector<8x128xf32>,
    return
  }
  func.func @transform_0(%arg0: i32) -> (i32, i32) {
    %c0_i32 = arith.constant 0 : i32
    %c0_i32_0 = arith.constant 0 : i32
    return %arg0, %c0_i32 : i32, i32
  }
  func.func @transform_1(%arg0: i32) -> (i32, i32, i32) {
    %c0_i32 = arith.constant 0 : i32
    %c0_i32_0 = arith.constant 0 : i32
    %c0_i32_1 = arith.constant 0 : i32
    %c0_i32_2 = arith.constant 0 : i32
    return %c0_i32, %c0_i32_0, %c0_i32_1 : i32, i32, i32
  }
  func.func @transform_2(%arg0: i32) -> (i32, i32, i32) {
    %c0_i32 = arith.constant 0 : i32
    %c0_i32_0 = arith.constant 0 : i32
    %c0_i32_1 = arith.constant 0 : i32
    %c0_i32_2 = arith.constant 0 : i32
    return %c0_i32, %c0_i32_0, %c0_i32_1 : i32, i32, i32
  }
  func.func @transform_3(%arg0: i32) -> (i32, i32) {
    %c0_i32 = arith.constant 0 : i32
    %c0_i32_0 = arith.constant 0 : i32
    return %arg0, %c0_i32 : i32, i32
  }
}

</mosaic_0001>

<bundles_post_ra>
// kernel: tpu_custom_call.1
= control target key start
LH: loop header
LB: loop body
LE: loop exit
PB: predicated region body
PF: predicated region fallthrough
CT: control target
= control target key end

     0   :  { %8 = vsyncpa [#allocation3], 0  ;;  %s1144_s0 = inlined_call_operand.hbm [shape: f32[16,128], index: 0, kind: input, shape index: {}]   ;;  %s1145_s1 = inlined_call_operand.hbm [shape: f32[8,128,128], index: 1, kind: input, shape index: {}]   ;;  %s1146_s2 = inlined_call_operand.hbm [shape: f32[8,1,128], index: 2, kind: input, shape index: {}]   ;;  %s1147_s3 = inlined_call_operand.hbm [shape: f32[16,128], index: 3, kind: output, shape index: {}]  }
   0x1   :  { %10 = vsyncpa [#allocation3 + $0x1], 0 }
   0x2   :  { %11 = vsyncpa [#allocation6], 0 }
   0x3   :  { %12 = vsyncpa [#allocation4], 0 }
   0x4   :  { %14 = vsyncpa [#allocation4 + $0x1], 0  ;;  %s990_s12 = smov 0   ;;  %s992_s13 = smov 0  }
   0x5   :  { %s994_s14 = smov 0   ;;  %s996_s15 = smov 0  }
   0x6 LB: > { %s130_s18 = sshll.u32 %s1145_s1, 4  ;;  %s1014_s19 = sadd.s32 4294967295, %s961_s15   ;;  %s961_s15 = sphi %s996_s15, %s1158_s15   ;;  %s957_s14 = sphi %s994_s14, %s1157_s14   ;;  %s953_s13 = sphi %s992_s13, %s1156_s13   ;;  %s949_s12 = sphi %s990_s12, %s1155_s12   ;;  %s131_s18 = int_to_ptr.hbm [resolvable:$true] %s130_s18 }
   0x7   : > { %p702_p0 = scmp.ge.s32.totalorder %s961_s15, 1  ;;  %p41_p1 = scmp.eq.s32.totalorder %s1014_s19, 0 }
   0x8   : > { %p119_p2 = scmp.lt.s32.totalorder %s961_s15, 3  ;;  %s963_s21 = smov [#allocation5]  }
   0x9   : > { %s132_s22 = sshll.u32 %s963_s21, 4  ;;  %s144_s25 = sshll.u32 %s1146_s2, 4  ;;  %s133_s22 = int_to_ptr.vmem [resolvable:$true] %s132_s22  ;;  %s145_s25 = int_to_ptr.hbm [resolvable:$true] %s144_s25 }
   0xa   : > { %p1019_p3 = pnand %p702_p0, %p119_p2  ;;  %s964_s26 = smov [#allocation7]  }
   0xb   : > { %s146_s27 = sshll.u32 %s964_s26, 4  ;;  %s965_s28 = smov 128   ;;  %s147_s27 = int_to_ptr.vmem [resolvable:$true] %s146_s27 }
   0xc   : > { %p729_p4 = pneg %p1019_p3  ;;  %s966_s29 = smov 8  }
   0xd   : > { %s967_s30 = smov 16   ;;  %s968_s4 = smov 1  }
   0xe   : > { %p730_p6 = pnand %p729_p4, %p41_p1  ;;  %s701_s5 = sadd.s32 4294967294, %s961_s15  }
   0xf   : > { %s1033_s6 = sadd.s32 1, %s961_s15   ;;  %s27_s8 = sadd.s32 1, %s957_s14 }
  0x10   : > { %732 = dma.hbm_to_vmem [thread:$0]  (!%p730_p6), %s131_s18, 16384, %s133_s22, [#allocation6], %s965_s28, %s965_s28, %s966_s29  }
  0x11   : > { %735 = dma.hbm_to_vmem [thread:$0]  (!%p730_p6), %s145_s25, 128, %s147_s27, [#allocation6], %s967_s30, %s967_s30, %s968_s4  }
  0x12   : > { %s24_s7 = ssub.s32 %s961_s15, %s1033_s6  ;;  %p34_p8 = scmp.ne.s32.totalorder %s957_s14, %s953_s13 }
  0x13   : > { %p25_p7 = scmp.eq.s32.totalorder %s24_s7, 0  ;;  %p35_p9 = scmp.eq.s32.totalorder %s961_s15, 0 }
  0x14   : > { %p40_p10 = scmp.ne.s32.totalorder %s953_s13, %s949_s12  ;;  %p106_p13 = scmp.eq.s32.totalorder %s1014_s19, 1 }
  0x15   : > { %s1044_s9 = scalar_select %p25_p7, %s957_s14, %s27_s8  }
  0x16   : > { %p1046_p11 = por %p35_p9, %p34_p8  ;;  %p1052_p12 = por %p41_p1, %p40_p10 }
  0x17   : > { %p112_p0 = scmp.eq.s32.totalorder %s701_s5, 1  ;;  %p746_p2 = scmp.lt.s32.totalorder %s961_s15, 2 }
  0x18   : > { %s160_s16 = sand.u32 1, %s957_s14   ;;  %p1059_p4 = por %p106_p13, %p34_p8 }
  0x19   : > { %p1063_p6 = por %p112_p0, %p40_p10  ;;  %s706_s21 = sshll.u32 %s160_s16, 3 }
  0x1a   : > { %s707_s22 = sshll.u32 %s961_s15, 3  ;;  %s164_s26 = scalar_lea.vmem [#allocation2], %s706_s21 }
  0x1b   : > { %s168_s25 = scalar_lea.hbm %s1144_s0, %s707_s22  ;;  %s172_s27 = sshll.u32 %s164_s26, 4  ;;  %s173_s27 = int_to_ptr.vmem [resolvable:$true] %s172_s27 }
  0x1c   : > { %s170_s28 = sshll.u32 %s168_s25, 4  ;;  %p1073_p7 = pnand %p746_p2, %p1046_p11  ;;  %s171_s28 = int_to_ptr.hbm [resolvable:$true] %s170_s28 }
  0x1d   : > { %s161_s30 = scalar_lea.sflag [#allocation3], %s160_s16  ;;  %s861_s4 = sshra.s32 %s171_s28, 4  ;;  %s862_s4 = int_to_ptr.hbm [resolvable:$true] %s861_s4 }
  0x1e   : > { %s863_s5 = scalar_lea.hbm %s862_s4, 8  ;;  %p865_p9 = pneg %p1073_p7 }
  0x1f   : > { %p864_p8 = scmp.ne.s32.totalorder %s862_s4, %s863_s5  ;;  %s868_s21 = scalar_lea.hbm %s1144_s0, 16 }
  0x20   : > { %p869_p11 = scmp.lt.s32.totalorder %s862_s4, %s1144_s0  ;;  %p870_p0 = scmp.lt.s32.totalorder %s868_s21, %s863_s5 }
  0x21   : > { %p866_p10 = pnand %p865_p9, %p864_p8 }
  0x22   : > { %p871_p2 = por %p870_p0, %p869_p11 }
  0x23   : > { %p867_p13 = pneg %p866_p10 }
  0x25   : > { %p872_p5 = pnand %p871_p2, %p867_p13 }
  0x27   : > { %875 = shalt.err (!%p872_p5)
}
  0x28   : > { %739 = dma.hbm_to_vmem [thread:$0]  (!%p1073_p7), %s171_s28, 128, %s173_s27, %s161_s30  }
  0x29   : > { %181 = sbr.rel (%p1019_p3) target bundleno = 1275 (0x4fb), region = 32  ;;  %s1090_s16 = sand.u32 (!%p1019_p3), 1, %s953_s13  }
  0x2a   : > { %s709_s23 = sshll.u32 (!%p1019_p3), %s1090_s16, 3  ;;  %s184_s24 = scalar_lea.sflag (!%p1019_p3), [#allocation3], %s1090_s16 }
  0x2b   : > { %s187_s25 = scalar_lea.vmem (!%p1019_p3), [#allocation2], %s709_s23 }
  0x2e   : > { %936 = dma.done.wait (%p1052_p12), %s184_s24, 128  }
  0x2f   : > { %938 = vsyncadd (%p1052_p12), %s184_s24, 4294967168 }
  0x30   : > { %940 = dma.done.wait (%p41_p1), [#allocation6], 16512  }
  0x31   : > { %942 = vsyncadd (%p41_p1), [#allocation6], 4294950784  ;;  %v1104_v0 = vld [vmem:[%s187_s25] sm:$0xff]  ;;  %v258_v4 = vld [vmem:[#allocation5 + $0x68] sm:$0xff]  ;;  %v969_v8 = vmov 128.0   ;;  %s714_s20 = sshll.u32 %s1014_s19, 3 }
  0x32   : > { %v260_v1 = vld [vmem:[#allocation5 + $0x78] sm:$0xff]  ;;  %v259_v2 = vld [vmem:[#allocation5 + $0x70] sm:$0xff]  ;;  %v222_v3 = vmul.f32 %v1104_v0, %v1104_v0  ;;  %v257_v5 = vld [vmem:[#allocation5 + $0x60] sm:$0xff]  ;;  %797 = vrcp.f32 %v969_v8  ;;  %s607_s27 = scalar_lea.hbm %s1147_s3, %s714_s20  ;;  %s220_s28 = scalar_lea.vmem [#allocation8], %s709_s23 }
  0x33   : > { %265 = vmatpush.msra.mxu0 %v260_v1  ;;  %v256_v6 = vld [vmem:[#allocation5 + $0x58] sm:$0xff]  ;;  %v255_v7 = vld [vmem:[#allocation5 + $0x50] sm:$0xff]  ;;  %v254_v9 = vld [vmem:[#allocation5 + $0x48] sm:$0xff]  ;;  %s609_s29 = sshll.u32 %s220_s28, 4  ;;  %s611_s30 = sshll.u32 %s607_s27, 4  ;;  %s610_s29 = int_to_ptr.vmem [resolvable:$true] %s609_s29  ;;  %s612_s30 = int_to_ptr.hbm [resolvable:$true] %s611_s30 }
  0x34   : > { %223 = vadd.xlane.f32.xlu0 %v222_v3  ;;  %v253_v10 = vld [vmem:[#allocation5 + $0x40] sm:$0xff]  ;;  %v252_v11 = vld [vmem:[#allocation5 + $0x38] sm:$0xff]  ;;  %v251_v13 = vld [vmem:[#allocation5 + $0x30] sm:$0xff]  ;;  %s597_s4 = scalar_lea.sflag [#allocation4], %s1090_s16  ;;  %s905_s5 = sshra.s32 %s612_s30, 4  ;;  %s906_s5 = int_to_ptr.hbm [resolvable:$true] %s905_s5 }
  0x35   : > { %266 = vmatpush.msra.mxu0 %v259_v2  ;;  %v250_v14 = vld [vmem:[#allocation5 + $0x28] sm:$0xff]  ;;  %v249_v16 = vld [vmem:[#allocation5 + $0x20] sm:$0xff]  ;;  %v248_v17 = vld [vmem:[#allocation5 + $0x18] sm:$0xff]  ;;  %s907_s19 = scalar_lea.hbm %s906_s5, 8  ;;  %s911_s21 = scalar_lea.hbm %s1147_s3, 16 }
  0x36   : > { %v247_v19 = vld [vmem:[#allocation5 + $0x10] sm:$0xff]  ;;  %v246_v20 = vld [vmem:[#allocation5 + $0x8] sm:$0xff]  ;;  %v245_v21 = vld [vmem:[#allocation5] sm:$0xff]  ;;  %p908_p1 = scmp.ne.s32.totalorder %s906_s5, %s907_s19  ;;  %p912_p12 = scmp.lt.s32.totalorder %s906_s5, %s1147_s3 }
  0x37   : > { %267 = vmatpush.msra.mxu0 %v258_v4  ;;  %v303_v23 = vld [vmem:[#allocation5 + $0xf8] sm:$0xff]  ;;  %v302_v24 = vld [vmem:[#allocation5 + $0xf0] sm:$0xff]  ;;  %v301_v26 = vld [vmem:[#allocation5 + $0xe8] sm:$0xff]  ;;  %p913_p7 = scmp.lt.s32.totalorder %s911_s21, %s907_s19 }
  0x38   : > { %v798_v12 = vpop.eup %797  ;;  %309 = vmatpush.msra.mxu1 %v303_v23  ;;  %v300_v27 = vld [vmem:[#allocation5 + $0xe0] sm:$0xff]  ;;  %v299_v29 = vld [vmem:[#allocation5 + $0xd8] sm:$0xff]  ;;  %v298_v32 = vld [vmem:[#allocation5 + $0xd0] sm:$0xff]  ;;  %p909_p3 = pnand %p908_p1, %p1059_p4 }
  0x39   : > { %268 = vmatpush.msra.mxu0 %v257_v5  ;;  %v226_v15 = vmul.f32 128.0, %v798_v12  ;;  %vm230_vm0 = vweird.f32 %v798_v12  ;;  %v297_v34 = vld [vmem:[#allocation5 + $0xc8] sm:$0xff]  ;;  %v296_v35 = vld [vmem:[#allocation5 + $0xc0] sm:$0xff]  ;;  %v295_v36 = vld [vmem:[#allocation5 + $0xb8] sm:$0xff]  ;;  %p914_p8 = por %p913_p7, %p912_p12 }
  0x3a   : > { %310 = vmatpush.msra.mxu1 %v302_v24  ;;  %v294_v37 = vld [vmem:[#allocation5 + $0xb0] sm:$0xff]  ;;  %v293_v39 = vld [vmem:[#allocation5 + $0xa8] sm:$0xff]  ;;  %v292_v41 = vld [vmem:[#allocation5 + $0xa0] sm:$0xff]  ;;  %p910_p5 = pneg %p909_p3 }
  0x3b   : > { %269 = vmatpush.msra.mxu0 %v256_v6  ;;  %v227_v18 = vsub.f32 1.0, %v226_v15  ;;  %v291_v48 = vld [vmem:[#allocation5 + $0x98] sm:$0xff]  ;;  %v290_v49 = vld [vmem:[#allocation5 + $0x90] sm:$0xff]  ;;  %v289_v50 = vld [vmem:[#allocation5 + $0x88] sm:$0xff] }
  0x3c   : > { %311 = vmatpush.msra.mxu1 %v301_v26  ;;  %v288_v51 = vld [vmem:[#allocation5 + $0x80] sm:$0xff]  ;;  %v347_v52 = vld [vmem:[#allocation5 + $0x178] sm:$0xff]  ;;  %v346_v53 = vld [vmem:[#allocation5 + $0x170] sm:$0xff]  ;;  %p915_p9 = pnand %p914_p8, %p910_p5 }
  0x3d   : > { %270 = vmatpush.msra.mxu0 %v255_v7  ;;  %v228_v22 = vmul.f32 %v798_v12, %v227_v18  ;;  %353 = vmatpush.msra.mxu2 %v347_v52  ;;  %v345_v54 = vld [vmem:[#allocation5 + $0x168] sm:$0xff]  ;;  %v344_v55 = vld [vmem:[#allocation5 + $0x160] sm:$0xff]  ;;  %v343_v56 = vld [vmem:[#allocation5 + $0x158] sm:$0xff] }
  0x3e   : > { %312 = vmatpush.msra.mxu1 %v300_v27  ;;  %v342_v57 = vld [vmem:[#allocation5 + $0x150] sm:$0xff]  ;;  %v341_v58 = vld [vmem:[#allocation5 + $0x148] sm:$0xff]  ;;  %v340_v59 = vld [vmem:[#allocation5 + $0x140] sm:$0xff] }
  0x3f   : > { %271 = vmatpush.msra.mxu0 %v254_v9  ;;  %v229_v25 = vadd.f32 %v798_v12, %v228_v22  ;;  %354 = vmatpush.msra.mxu2 %v346_v53  ;;  %v339_v60 = vld [vmem:[#allocation5 + $0x138] sm:$0xff]  ;;  %v338_v61 = vld [vmem:[#allocation5 + $0x130] sm:$0xff]  ;;  %v337_v62 = vld [vmem:[#allocation5 + $0x128] sm:$0xff] }
  0x40   : > { %313 = vmatpush.msra.mxu1 %v299_v29  ;;  %v336_v63 = vld [vmem:[#allocation5 + $0x120] sm:$0xff]  ;;  %v335_v5 = vld [vmem:[#allocation5 + $0x118] sm:$0xff]  ;;  %v334_v6 = vld [vmem:[#allocation5 + $0x110] sm:$0xff] }
  0x41   : > { %272 = vmatpush.msra.mxu0 %v253_v10  ;;  %v231_v28 = vsel %vm230_vm0, %v798_v12, %v229_v25  ;;  %355 = vmatpush.msra.mxu2 %v345_v54  ;;  %v333_v7 = vld [vmem:[#allocation5 + $0x108] sm:$0xff]  ;;  %v332_v8 = vld [vmem:[#allocation5 + $0x100] sm:$0xff]  ;;  %v391_v9 = vld [vmem:[#allocation5 + $0x1f8] sm:$0xff] }
  0x42   : > { %314 = vmatpush.msra.mxu1 %v298_v32  ;;  %v390_v10 = vld [vmem:[#allocation5 + $0x1f0] sm:$0xff]  ;;  %397 = vmatpush.msra.mxu3 %v391_v9  ;;  %v388_v12 = vld [vmem:[#allocation5 + $0x1e0] sm:$0xff]  ;;  %v385_v15 = vld [vmem:[#allocation5 + $0x1c8] sm:$0xff] }
  0x43   : > { %273 = vmatpush.msra.mxu0 %v252_v11  ;;  %356 = vmatpush.msra.mxu2 %v344_v55  ;;  %v389_v11 = vld [vmem:[#allocation5 + $0x1e8] sm:$0xff]  ;;  %v382_v18 = vld [vmem:[#allocation5 + $0x1b0] sm:$0xff]  ;;  %v379_v26 = vld [vmem:[#allocation5 + $0x198] sm:$0xff] }
  0x44   : > { %315 = vmatpush.msra.mxu1 %v297_v34  ;;  %398 = vmatpush.msra.mxu3 %v390_v10  ;;  %v378_v27 = vld [vmem:[#allocation5 + $0x190] sm:$0xff]  ;;  %v376_v29 = vld [vmem:[#allocation5 + $0x180] sm:$0xff]  ;;  %v433_v32 = vld [vmem:[#allocation5 + $0x268] sm:$0xff] }
  0x45   : > { %274 = vmatpush.msra.mxu0 %v251_v13  ;;  %357 = vmatpush.msra.mxu2 %v343_v56  ;;  %v387_v13 = vld [vmem:[#allocation5 + $0x1d8] sm:$0xff]  ;;  %v478_v52 = vld [vmem:[#allocation5 + $0x2f0] sm:$0xff]  ;;  %v477_v53 = vld [vmem:[#allocation5 + $0x2e8] sm:$0xff] }
  0x46   : > { %316 = vmatpush.msra.mxu1 %v296_v35  ;;  %399 = vmatpush.msra.mxu3 %v389_v11  ;;  %v431_v34 = vld [vmem:[#allocation5 + $0x258] sm:$0xff]  ;;  %v430_v35 = vld [vmem:[#allocation5 + $0x250] sm:$0xff]  ;;  %v476_v54 = vld [vmem:[#allocation5 + $0x2e0] sm:$0xff] }
  0x47   : > { %275 = vmatpush.msra.mxu0 %v250_v14  ;;  %358 = vmatpush.msra.mxu2 %v342_v57  ;;  %v386_v14 = vld [vmem:[#allocation5 + $0x1d0] sm:$0xff]  ;;  %v475_v55 = vld [vmem:[#allocation5 + $0x2d8] sm:$0xff]  ;;  %v473_v57 = vld [vmem:[#allocation5 + $0x2c8] sm:$0xff] }
  0x48   : > { %317 = vmatpush.msra.mxu1 %v295_v36  ;;  %400 = vmatpush.msra.mxu3 %v388_v12  ;;  %v429_v36 = vld [vmem:[#allocation5 + $0x248] sm:$0xff]  ;;  %v474_v56 = vld [vmem:[#allocation5 + $0x2d0] sm:$0xff]  ;;  %v520_v11 = vld [vmem:[#allocation5 + $0x360] sm:$0xff] }
  0x49   : > { %276 = vmatpush.msra.mxu0 %v249_v16  ;;  %359 = vmatpush.msra.mxu2 %v341_v58  ;;  %v384_v16 = vld [vmem:[#allocation5 + $0x1c0] sm:$0xff]  ;;  %v522_v9 = vld [vmem:[#allocation5 + $0x370] sm:$0xff]  ;;  %v521_v10 = vld [vmem:[#allocation5 + $0x368] sm:$0xff] }
  0x4a   : > { %318 = vmatpush.msra.mxu1 %v294_v37  ;;  %401 = vmatpush.msra.mxu3 %v387_v13  ;;  %v428_v37 = vld [vmem:[#allocation5 + $0x240] sm:$0xff]  ;;  %v519_v12 = vld [vmem:[#allocation5 + $0x358] sm:$0xff]  ;;  %v518_v13 = vld [vmem:[#allocation5 + $0x350] sm:$0xff] }
  0x4b   : > { %277 = vmatpush.msra.mxu0 %v248_v17  ;;  %360 = vmatpush.msra.mxu2 %v340_v59  ;;  %v383_v17 = vld [vmem:[#allocation5 + $0x1b8] sm:$0xff]  ;;  %v472_v58 = vld [vmem:[#allocation5 + $0x2c0] sm:$0xff] }
  0x4c   : > { %319 = vmatpush.msra.mxu1 %v293_v39  ;;  %402 = vmatpush.msra.mxu3 %v386_v14  ;;  %v426_v39 = vld [vmem:[#allocation5 + $0x230] sm:$0xff]  ;;  %v471_v59 = vld [vmem:[#allocation5 + $0x2b8] sm:$0xff]  ;;  %v517_v14 = vld [vmem:[#allocation5 + $0x348] sm:$0xff] }
  0x4d   : > { %278 = vmatpush.msra.mxu0 %v247_v19  ;;  %361 = vmatpush.msra.mxu2 %v339_v60  ;;  %v381_v19 = vld [vmem:[#allocation5 + $0x1a8] sm:$0xff]  ;;  %v470_v60 = vld [vmem:[#allocation5 + $0x2b0] sm:$0xff] }
  0x4e   : > { %320 = vmatpush.msra.mxu1 %v292_v41  ;;  %403 = vmatpush.msra.mxu3 %v385_v15  ;;  %v424_v41 = vld [vmem:[#allocation5 + $0x220] sm:$0xff] }
  0x4f   : > { %279 = vmatpush.msra.mxu0 %v246_v20  ;;  %362 = vmatpush.msra.mxu2 %v338_v61  ;;  %v380_v20 = vld [vmem:[#allocation5 + $0x1a0] sm:$0xff]  ;;  %v469_v61 = vld [vmem:[#allocation5 + $0x2a8] sm:$0xff] }
  0x50   : > { %321 = vmatpush.msra.mxu1 %v291_v48  ;;  %404 = vmatpush.msra.mxu3 %v384_v16  ;;  %v422_v48 = vld [vmem:[#allocation5 + $0x210] sm:$0xff]  ;;  %v516_v15 = vld [vmem:[#allocation5 + $0x340] sm:$0xff]  ;;  %v515_v16 = vld [vmem:[#allocation5 + $0x338] sm:$0xff] }
  0x51   : > { %280 = vmatpush.msra.mxu0 %v245_v21  ;;  %363 = vmatpush.msra.mxu2 %v337_v62  ;;  %v790_v21 = vld [vmem:[#allocation7 + $0x1] ss:$0 sm:$0xff] }
  0x52   : > { %322 = vmatpush.msra.mxu1 %v290_v49  ;;  %405 = vmatpush.msra.mxu3 %v383_v17  ;;  %v421_v49 = vld [vmem:[#allocation5 + $0x208] sm:$0xff]  ;;  %v468_v62 = vld [vmem:[#allocation5 + $0x2a0] sm:$0xff]  ;;  %v514_v17 = vld [vmem:[#allocation5 + $0x330] sm:$0xff] }
  0x53   : > { %364 = vmatpush.msra.mxu2 %v336_v63  ;;  %v792_v63 = vld [vmem:[#allocation7 + $0x3] ss:$0 sm:$0xff] }
  0x54   : > { %323 = vmatpush.msra.mxu1 %v289_v50  ;;  %406 = vmatpush.msra.mxu3 %v382_v18  ;;  %v420_v50 = vld [vmem:[#allocation5 + $0x200] sm:$0xff]  ;;  %v513_v18 = vld [vmem:[#allocation5 + $0x328] sm:$0xff] }
  0x55   : > { %365 = vmatpush.msra.mxu2 %v335_v5  ;;  %v466_v5 = vld [vmem:[#allocation5 + $0x290] sm:$0xff] }
  0x56   : > { %324 = vmatpush.msra.mxu1 %v288_v51  ;;  %407 = vmatpush.msra.mxu3 %v381_v19  ;;  %v479_v51 = vld [vmem:[#allocation5 + $0x2f8] sm:$0xff]  ;;  %v512_v19 = vld [vmem:[#allocation5 + $0x320] sm:$0xff] }
  0x57   : > { %366 = vmatpush.msra.mxu2 %v334_v6  ;;  %v465_v6 = vld [vmem:[#allocation5 + $0x288] sm:$0xff] }
  0x58   : > { %408 = vmatpush.msra.mxu3 %v380_v20  ;;  %485 = vmatpush.msrb.mxu1 %v479_v51  ;;  %v793_v20 = vld [vmem:[#allocation7 + $0x4] ss:$0 sm:$0xff] }
  0x59   : > { %367 = vmatpush.msra.mxu2 %v333_v7  ;;  %v464_v7 = vld [vmem:[#allocation5 + $0x280] sm:$0xff] }
  0x5a   : > { %409 = vmatpush.msra.mxu3 %v379_v26  ;;  %486 = vmatpush.msrb.mxu1 %v478_v52  ;;  %v510_v26 = vld [vmem:[#allocation5 + $0x310] sm:$0xff] }
  0x5b   : > { %368 = vmatpush.msra.mxu2 %v332_v8  ;;  %v523_v8 = vld [vmem:[#allocation5 + $0x378] sm:$0xff] }
  0x5c   : > { %410 = vmatpush.msra.mxu3 %v378_v27  ;;  %487 = vmatpush.msrb.mxu1 %v477_v53  ;;  %v509_v27 = vld [vmem:[#allocation5 + $0x308] sm:$0xff] }
  0x5d   : > { %529 = vmatpush.msrb.mxu2 %v523_v8 }
  0x5e   : > { %488 = vmatpush.msrb.mxu1 %v476_v54 }
  0x5f   : > { %530 = vmatpush.msrb.mxu2 %v522_v9 }
  0x60   : > { %489 = vmatpush.msrb.mxu1 %v475_v55  ;;  %v796_v55 = vld [vmem:[#allocation7 + $0x7] ss:$0 sm:$0xff] }
  0x61   : > { %531 = vmatpush.msrb.mxu2 %v521_v10 }
  0x62   : > { %490 = vmatpush.msrb.mxu1 %v474_v56 }
  0x63   : > { %532 = vmatpush.msrb.mxu2 %v520_v11 }
  0x64   : > { %491 = vmatpush.msrb.mxu1 %v473_v57 }
  0x65   : > { %533 = vmatpush.msrb.mxu2 %v519_v12 }
  0x66   : > { %492 = vmatpush.msrb.mxu1 %v472_v58 }
  0x67   : > { %534 = vmatpush.msrb.mxu2 %v518_v13 }
  0x68   : > { %493 = vmatpush.msrb.mxu1 %v471_v59 }
  0x69   : > { %535 = vmatpush.msrb.mxu2 %v517_v14 }
  0x6a   : > { %494 = vmatpush.msrb.mxu1 %v470_v60 }
  0x6b   : > { %536 = vmatpush.msrb.mxu2 %v516_v15 }
  0x6c   : > { %495 = vmatpush.msrb.mxu1 %v469_v61 }
  0x6d   : > { %537 = vmatpush.msrb.mxu2 %v515_v16 }
  0x6e   : > { %496 = vmatpush.msrb.mxu1 %v468_v62 }
  0x6f   : > { %538 = vmatpush.msrb.mxu2 %v514_v17 }
  0x71   : > { %539 = vmatpush.msrb.mxu2 %v513_v18 }
  0x73   : > { %540 = vmatpush.msrb.mxu2 %v512_v19 }
  0xa7   : > { %v224_v30 = vpop.xlane.xlu0 %223 }
  0xa8   : > { %v232_v31 = vmul.f32 %v231_v28, %v224_v30  ;;  %v377_v28 = vld [vmem:[#allocation5 + $0x188] sm:$0xff]  ;;  %v435_v30 = vld [vmem:[#allocation5 + $0x278] sm:$0xff] }
  0xa9   : > { %411 = vmatpush.msra.mxu3 %v377_v28  ;;  %441 = vmatpush.msrb.mxu0 %v435_v30  ;;  %v508_v28 = vld [vmem:[#allocation5 + $0x300] sm:$0xff]  ;;  %v566_v30 = vld [vmem:[#allocation5 + $0x3f0] sm:$0xff] }
  0xaa   : > { %v233_v33 = vadd.f32 1e-06, %v232_v31  ;;  %v434_v31 = vld [vmem:[#allocation5 + $0x270] sm:$0xff] }
  0xab   : > { %412 = vmatpush.msra.mxu3 %v376_v29  ;;  %442 = vmatpush.msrb.mxu0 %v434_v31  ;;  %v567_v29 = vld [vmem:[#allocation5 + $0x3f8] sm:$0xff]  ;;  %v565_v31 = vld [vmem:[#allocation5 + $0x3e8] sm:$0xff] }
  0xac   : > { %799 = vrsqrt.f32 %v233_v33  ;;  %vm240_vm2 = vweird.f32 %v233_v33 }
  0xad   : > { %443 = vmatpush.msrb.mxu0 %v433_v32  ;;  %573 = vmatpush.msrb.mxu3 %v567_v29  ;;  %v564_v32 = vld [vmem:[#allocation5 + $0x3e0] sm:$0xff] }
  0xaf   : > { %574 = vmatpush.msrb.mxu3 %v566_v30 }
  0xb1   : > { %575 = vmatpush.msrb.mxu3 %v565_v31 }
  0xb2   : > { %v800_v38 = vpop.eup %799 }
  0xb3   : > { %v235_v40 = vmul.f32 %v800_v38, %v233_v33  ;;  %vm241_vm1 = vweird.f32 %v800_v38  ;;  %v432_v33 = vld [vmem:[#allocation5 + $0x260] sm:$0xff]  ;;  %576 = vmatpush.msrb.mxu3 %v564_v32 }
  0xb4   : > { %vm242_vm3 = vmor %vm240_vm2, %vm241_vm1  ;;  %444 = vmatpush.msrb.mxu0 %v432_v33  ;;  %v563_v33 = vld [vmem:[#allocation5 + $0x3d8] sm:$0xff] }
  0xb5   : > { %v236_v42 = vmul.f32 %v800_v38, %v235_v40  ;;  %v425_v40 = vld [vmem:[#allocation5 + $0x228] sm:$0xff]  ;;  %577 = vmatpush.msrb.mxu3 %v563_v33 }
  0xb6   : > { %445 = vmatpush.msrb.mxu0 %v431_v34  ;;  %v562_v34 = vld [vmem:[#allocation5 + $0x3d0] sm:$0xff] }
  0xb7   : > { %v237_v43 = vmul.f32 0.5, %v236_v42  ;;  %v791_v42 = vld [vmem:[#allocation7 + $0x2] ss:$0 sm:$0xff]  ;;  %578 = vmatpush.msrb.mxu3 %v562_v34 }
  0xb8   : > { %446 = vmatpush.msrb.mxu0 %v430_v35  ;;  %v561_v35 = vld [vmem:[#allocation5 + $0x3c8] sm:$0xff] }
  0xb9   : > { %v238_v44 = vsub.f32 1.5, %v237_v43  ;;  %579 = vmatpush.msrb.mxu3 %v561_v35 }
  0xba   : > { %447 = vmatpush.msrb.mxu0 %v429_v36  ;;  %v560_v36 = vld [vmem:[#allocation5 + $0x3c0] sm:$0xff] }
  0xbb   : > { %v239_v45 = vmul.f32 %v800_v38, %v238_v44  ;;  %580 = vmatpush.msrb.mxu3 %v560_v36 }
  0xbc   : > { %448 = vmatpush.msrb.mxu0 %v428_v37  ;;  %v559_v37 = vld [vmem:[#allocation5 + $0x3b8] sm:$0xff] }
  0xbd   : > { %v243_v46 = vsel %vm242_vm3, %v800_v38, %v239_v45  ;;  %v427_v38 = vld [vmem:[#allocation5 + $0x238] sm:$0xff]  ;;  %581 = vmatpush.msrb.mxu3 %v559_v37 }
  0xbe   : > { %v244_v47 = vmul.f32 %v243_v46, %v1104_v0  ;;  %v789_v0 = vld [vmem:[#allocation7] ss:$0 sm:$0xff]  ;;  %449 = vmatpush.msrb.mxu0 %v427_v38  ;;  %v558_v38 = vld [vmem:[#allocation5 + $0x3b0] sm:$0xff] }
  0xbf   : > { %582 = vmatpush.msrb.mxu3 %v558_v38 }
  0xc0   : > { %281 = vmatmul.f32.vlgmr.msra.gmra.mxu0 %v244_v47  ;;  %v423_v47 = vld [vmem:[#allocation5 + $0x218] sm:$0xff] }
  0xc1   : > { %450 = vmatpush.msrb.mxu0 %v426_v39  ;;  %v557_v39 = vld [vmem:[#allocation5 + $0x3a8] sm:$0xff] }
  0xc2   : > { %583 = vmatpush.msrb.mxu3 %v557_v39 }
  0xc3   : > { %451 = vmatpush.msrb.mxu0 %v425_v40  ;;  %v556_v40 = vld [vmem:[#allocation5 + $0x3a0] sm:$0xff] }
  0xc4   : > { %584 = vmatpush.msrb.mxu3 %v556_v40 }
  0xc5   : > { %452 = vmatpush.msrb.mxu0 %v424_v41  ;;  %v794_v41 = vld [vmem:[#allocation7 + $0x5] ss:$0 sm:$0xff] }
  0xc7   : > { %453 = vmatpush.msrb.mxu0 %v423_v47  ;;  %v554_v47 = vld [vmem:[#allocation5 + $0x390] sm:$0xff] }
  0xc9   : > { %454 = vmatpush.msrb.mxu0 %v422_v48  ;;  %v553_v48 = vld [vmem:[#allocation5 + $0x388] sm:$0xff] }
  0xcb   : > { %455 = vmatpush.msrb.mxu0 %v421_v49  ;;  %v552_v49 = vld [vmem:[#allocation5 + $0x380] sm:$0xff] }
  0xcd   : > { %456 = vmatpush.msrb.mxu0 %v420_v50  ;;  %v795_v50 = vld [vmem:[#allocation7 + $0x6] ss:$0 sm:$0xff] }
 0x13d   : > { %v282_v1 = vpop.f32.mrf.mxu0 }
 0x13e   : > { %v283_v2 = vadd.f32 %v789_v0, %v282_v1 }
 0x140   : > { %v285_v3 = vmul.f32 0.2, %v283_v2 }
 0x142   : > { %v286_v4 = vmax.f32 %v283_v2, %v285_v3 }
 0x144   : > { %325 = vmatmul.f32.vlgmr.msra.gmra.mxu1 %v286_v4  ;;  %v467_v4 = vld [vmem:[#allocation5 + $0x298] sm:$0xff] }
 0x145   : > { %497 = vmatpush.msrb.mxu1 %v467_v4 }
 0x147   : > { %498 = vmatpush.msrb.mxu1 %v466_v5 }
 0x149   : > { %499 = vmatpush.msrb.mxu1 %v465_v6 }
 0x14b   : > { %500 = vmatpush.msrb.mxu1 %v464_v7 }
 0x1c1   : > { %v326_v22 = vpop.f32.mrf.mxu1 }
 0x1c2   : > { %v327_v23 = vadd.f32 %v790_v21, %v326_v22 }
 0x1c4   : > { %v329_v24 = vmul.f32 0.2, %v327_v23 }
 0x1c6   : > { %v330_v25 = vmax.f32 %v327_v23, %v329_v24 }
 0x1c8   : > { %369 = vmatmul.f32.vlgmr.msra.gmra.mxu2 %v330_v25  ;;  %v511_v25 = vld [vmem:[#allocation5 + $0x318] sm:$0xff] }
 0x1c9   : > { %541 = vmatpush.msrb.mxu2 %v511_v25 }
 0x1cb   : > { %542 = vmatpush.msrb.mxu2 %v510_v26 }
 0x1cd   : > { %543 = vmatpush.msrb.mxu2 %v509_v27 }
 0x1cf   : > { %544 = vmatpush.msrb.mxu2 %v508_v28 }
 0x24b   : > { %v370_v43 = vpop.f32.mrf.mxu2 }
 0x24c   : > { %v371_v44 = vadd.f32 %v791_v42, %v370_v43 }
 0x24e   : > { %v373_v45 = vmul.f32 0.2, %v371_v44 }
 0x250   : > { %v374_v46 = vmax.f32 %v371_v44, %v373_v45 }
 0x252   : > { %413 = vmatmul.f32.vlgmr.msra.gmra.mxu3 %v374_v46  ;;  %v555_v46 = vld [vmem:[#allocation5 + $0x398] sm:$0xff] }
 0x253   : > { %585 = vmatpush.msrb.mxu3 %v555_v46 }
 0x255   : > { %586 = vmatpush.msrb.mxu3 %v554_v47 }
 0x257   : > { %587 = vmatpush.msrb.mxu3 %v553_v48 }
 0x259   : > { %588 = vmatpush.msrb.mxu3 %v552_v49 }
 0x2d5   : > { %v414_v0 = vpop.f32.mrf.mxu3 }
 0x2d6   : > { %v415_v1 = vadd.f32 %v792_v63, %v414_v0 }
 0x2d8   : > { %v417_v2 = vmul.f32 0.2, %v415_v1 }
 0x2da   : > { %v418_v3 = vmax.f32 %v415_v1, %v417_v2 }
 0x2dc   : > { %457 = vmatmul.f32.vlgmr.msrb.gmra.mxu0 %v418_v3 }
 0x359   : > { %v458_v21 = vpop.f32.mrf.mxu0 }
 0x35a   : > { %v459_v22 = vadd.f32 %v793_v20, %v458_v21 }
 0x35c   : > { %v461_v23 = vmul.f32 0.2, %v459_v22 }
 0x35e   : > { %v462_v24 = vmax.f32 %v459_v22, %v461_v23 }
 0x360   : > { %501 = vmatmul.f32.vlgmr.msrb.gmra.mxu1 %v462_v24 }
 0x3dd   : > { %v502_v42 = vpop.f32.mrf.mxu1 }
 0x3de   : > { %v503_v43 = vadd.f32 %v794_v41, %v502_v42 }
 0x3e0   : > { %v505_v44 = vmul.f32 0.2, %v503_v43 }
 0x3e2   : > { %v506_v45 = vmax.f32 %v503_v43, %v505_v44 }
 0x3e4   : > { %545 = vmatmul.f32.vlgmr.msrb.gmra.mxu2 %v506_v45 }
 0x467   : > { %v546_v51 = vpop.f32.mrf.mxu2 }
 0x468   : > { %v547_v52 = vadd.f32 %v795_v50, %v546_v51 }
 0x46a   : > { %v549_v53 = vmul.f32 0.2, %v547_v52 }
 0x46c   : > { %v550_v54 = vmax.f32 %v547_v52, %v549_v53 }
 0x46e   : > { %589 = vmatmul.f32.vlgmr.msrb.gmra.mxu3 %v550_v54 }
 0x4f1   : > { %v590_v56 = vpop.f32.mrf.mxu3 }
 0x4f2   : > { %v591_v57 = vadd.f32 %v796_v55, %v590_v56 }
 0x4f4   : > { %v593_v58 = vmul.f32 0.2, %v591_v57 }
 0x4f6   : > { %v594_v59 = vmax.f32 %v591_v57, %v593_v58 }
 0x4f8   : > { %595 = vst [vmem:[%s220_s28] sm:$0xff] %v594_v59 }
 0x4f9   : > { %918 = shalt.err (!%p915_p9)
}
 0x4fa   : > { %727 = dma.vmem_to_hbm [thread:$0]  (%p1059_p4), %s610_s29, 128, %s612_s30, %s597_s4  }
 0x4fb PF: > { %s623_s16 = sand.u32 1, %s949_s12   ;;  %p1154_p10 = scmp.ge.s32.totalorder %s961_s15, 2 }
 0x4fc   : > { %s624_s23 = scalar_lea.sflag [#allocation4], %s623_s16 }
 0x4fd   : > { %p741_p13 = pnand %p1154_p10, %p1063_p6 }
 0x4ff   : > { %p742_p11 = pneg %p741_p13 }
 0x501   : > { %944 = dma.done.wait (%p742_p11), %s624_s23, 128  }
 0x502   : > { %946 = vsyncadd (%p742_p11), %s624_s23, 4294967168  ;;  %p17_p0 = scmp.ge.s32.totalorder %s1033_s6, 4   ;;  %s1155_s12 = smov %s953_s13 }
 0x503   : > { %s1156_s13 = smov %s957_s14  ;;  %s1157_s14 = smov %s1044_s9 }
 0x504   : > { %s1158_s15 = smov %s1033_s6  ;;  %19 = sbr.rel (!%p17_p0) target bundleno = 6 (0x6), region = 99 }
 0x509   :  { %630 = vsyncpa [#allocation3], 1 }
 0x50a   :  { %632 = vsyncpa [#allocation3 + $0x1], 1 }
 0x50b   :  { %633 = vsyncpa [#allocation6], 1 }
 0x50c   :  { %634 = vsyncpa [#allocation4], 1 }
 0x50d   :  { %636 = vsyncpa [#allocation4 + $0x1], 1 }

</bundles_post_ra>
